<compile_context>
chip_gen: v7x
topology: tpu7x:2x2x1
jax: 0.10.0
libtpu: 0.0.40
codegen_flags: <defaults>
</compile_context>

<pallas_src>
import functools

import jax
import jax.numpy as jnp
from jax.experimental import pallas as pl
from jax.experimental.pallas import tpu as pltpu

_BN_EPS = 1e-5


def _leaky_relu(x, slope=0.2):
    return jnp.where(x > 0, x, slope * x)


def _round_up(x, m):
    return ((x + m - 1) // m) * m


# ---------------------------------------------------------------------------
# Kernel: one batch tile of
#   (z @ W1' + b1') -> LReLU -> (@ W2' + b2') -> LReLU -> (@ W3 + b3)
# Weights may be bf16 (matmul inputs); accumulation and epilogue are f32.
# ---------------------------------------------------------------------------
def dense_decoder_kernel(z_ref, w1_ref, b1_ref, w2_ref, b2_ref, w3_ref, b3_ref,
                         out_ref):
    h = jnp.dot(z_ref[...], w1_ref[...], preferred_element_type=jnp.float32)
    h = _leaky_relu(h + b1_ref[...])                      # f32 epilogue

    h = jnp.dot(h.astype(w2_ref.dtype), w2_ref[...],
                preferred_element_type=jnp.float32)
    h = _leaky_relu(h + b2_ref[...])                      # f32 epilogue

    out = jnp.dot(h.astype(w3_ref.dtype), w3_ref[...],
                  preferred_element_type=jnp.float32) + b3_ref[...]
    out_ref[...] = out.astype(out_ref.dtype)


# ---------------------------------------------------------------------------
# Wrapper
# ---------------------------------------------------------------------------
def dense_decoder_forward(z, folded, *, tb=256, matmul_dtype=jnp.bfloat16):
    """z: (B, latent) f32.  folded: BN-folded params (see fold_batchnorm)."""
    B, L = z.shape
    H = folded["w1"].shape[1]
    D = folded["w3"].shape[1]

    w1 = folded["w1"].astype(matmul_dtype)
    w2 = folded["w2"].astype(matmul_dtype)
    w3 = folded["w3"].astype(matmul_dtype)
    b1 = folded["b1"].astype(jnp.float32)
    b2 = folded["b2"].astype(jnp.float32)
    b3 = folded["b3"].astype(jnp.float32)
    zc = z.astype(matmul_dtype)

    # Batch tile: multiple of 8 (sublane); pad B so every block is full.
    tb = max(8, min(tb, _round_up(B, 8)))
    b_pad = _round_up(B, tb)
    if b_pad != B:
        zc = jnp.pad(zc, ((0, b_pad - B), (0, 0)))
    grid = (b_pad // tb,)

    const = lambda i: (0, 0)   # weights/biases: fetched once, VMEM-resident
    itemsize = zc.dtype.itemsize
    cost = pl.CostEstimate(
        flops=2 * b_pad * (L * H + H * H + H * D),
        transcendentals=0,
        bytes_accessed=(zc.size * itemsize
                        + (w1.size + w2.size + w3.size) * itemsize
                        + (b1.size + b2.size + b3.size) * 4
                        + b_pad * D * 4),
    )

    out = pl.pallas_call(
        dense_decoder_kernel,
        out_shape=jax.ShapeDtypeStruct((b_pad, D), jnp.float32),
        grid=grid,
        in_specs=[
            pl.BlockSpec((tb, L), lambda i: (i, 0)),   # z tile: pipelined
            pl.BlockSpec((L, H), const),
            pl.BlockSpec((1, H), const),
            pl.BlockSpec((H, H), const),
            pl.BlockSpec((1, H), const),
            pl.BlockSpec((H, D), const),
            pl.BlockSpec((1, D), const),
        ],
        out_specs=pl.BlockSpec((tb, D), lambda i: (i, 0)),
        compiler_params=pltpu.CompilerParams(
            dimension_semantics=("parallel",)),       # megacore split on v7x
        cost_estimate=cost,
    )(zc, w1, b1, w2, b2, w3, b3)
    return out[:B]


# ---------------------------------------------------------------------------
# Params: PyTorch-style raw params + wrapper-side BatchNorm folding.
# ---------------------------------------------------------------------------
def init_params(key, data_size, hidden_size, latent_size):
    """Linear weights stored pre-transposed to (in, out); BatchNorm params use
    non-trivial gamma/beta/running stats so the folding is actually exercised."""
    ks = jax.random.split(key, 14)
    D, H, L = data_size, hidden_size, latent_size

    def lin(kw, kb, fan_in, fan_out):
        bound = 1.0 / jnp.sqrt(fan_in)
        w = jax.random.uniform(kw, (fan_in, fan_out), jnp.float32, -bound, bound)
        b = jax.random.uniform(kb, (1, fan_out), jnp.float32, -bound, bound)
        return w, b

    def bn(kg, kb, km, kv, n):
        g = jax.random.uniform(kg, (1, n), jnp.float32, 0.5, 1.5)
        be = 0.1 * jax.random.normal(kb, (1, n), jnp.float32)
        rm = 0.1 * jax.random.normal(km, (1, n), jnp.float32)
        rv = jax.random.uniform(kv, (1, n), jnp.float32, 0.5, 1.5)
        return g, be, rm, rv

    w1, b1 = lin(ks[0], ks[1], L, H)
    g1, be1, rm1, rv1 = bn(ks[2], ks[3], ks[4], ks[5], H)
    w2, b2 = lin(ks[6], ks[7], H, H)
    g2, be2, rm2, rv2 = bn(ks[8], ks[9], ks[10], ks[11], H)
    w3, b3 = lin(ks[12], ks[13], H, D)
    return dict(w1=w1, b1=b1, g1=g1, be1=be1, rm1=rm1, rv1=rv1,
                w2=w2, b2=b2, g2=g2, be2=be2, rm2=rm2, rv2=rv2,
                w3=w3, b3=b3)


def fold_batchnorm(p, eps=_BN_EPS):
    """Fold eval-mode BatchNorm1d into the preceding Linear:
       ((x@W + b) - rm)*g/sqrt(rv+eps) + be  ==  x @ (W*s) + ((b - rm)*s + be)."""
    s1 = p["g1"] * jax.lax.rsqrt(p["rv1"] + eps)
    s2 = p["g2"] * jax.lax.rsqrt(p["rv2"] + eps)
    return dict(
        w1=p["w1"] * s1, b1=(p["b1"] - p["rm1"]) * s1 + p["be1"],
        w2=p["w2"] * s2, b2=(p["b2"] - p["rm2"]) * s2 + p["be2"],
        w3=p["w3"], b3=p["b3"],
    )


# ---------------------------------------------------------------------------
# Pure-JAX references
# ---------------------------------------------------------------------------
def reference_forward(z, p, eps=_BN_EPS, precision=None):
    """Unfused eval-mode forward matching the PyTorch module structure."""
    def bn(x, g, be, rm, rv):
        return (x - rm) * jax.lax.rsqrt(rv + eps) * g + be
    dot = functools.partial(jnp.dot, precision=precision)
    h = _leaky_relu(bn(dot(z, p["w1"]) + p["b1"],
                       p["g1"], p["be1"], p["rm1"], p["rv1"]))
    h = _leaky_relu(bn(dot(h, p["w2"]) + p["b2"],
                       p["g2"], p["be2"], p["rm2"], p["rv2"]))
    return dot(h, p["w3"]) + p["b3"]


def reference_forward_folded(z, f, matmul_dtype=jnp.float32, precision=None):
    """Forward on BN-folded params with the same dtype path as the kernel."""
    dot = functools.partial(jnp.dot, preferred_element_type=jnp.float32,
                            precision=precision)
    h = _leaky_relu(dot(z.astype(matmul_dtype),
                        f["w1"].astype(matmul_dtype)) + f["b1"])
    h = _leaky_relu(dot(h.astype(matmul_dtype),
                        f["w2"].astype(matmul_dtype)) + f["b2"])
    return dot(h.astype(matmul_dtype), f["w3"].astype(matmul_dtype)) + f["b3"]


if __name__ == "__main__":
    data_size, hidden_size, latent_size, batch = 64, 32, 16, 32

    key = jax.random.PRNGKey(0)
    k_z, k_p = jax.random.split(key)
    z = jax.random.normal(k_z, (batch, latent_size), jnp.float32)
    params = init_params(k_p, data_size, hidden_size, latent_size)
    folded = fold_batchnorm(params)

    # (a) BN-fold identity vs. the unfused PyTorch-style forward (true f32).
    hi = jax.lax.Precision.HIGHEST
    ref_unfused = reference_forward(z, params, precision=hi)
    ref_fold_hi = reference_forward_folded(z, folded, precision=hi)
    assert jnp.allclose(ref_fold_hi, ref_unfused, atol=1e-5, rtol=1e-5), \
        "BN fold mismatch"

    # (b) f32 kernel (tb=16 -> grid of 2, exercises pipelining) vs. matching
    #     pure-JAX reference: exact-semantics check.
    out_f32 = jax.block_until_ready(
        dense_decoder_forward(z, folded, tb=16, matmul_dtype=jnp.float32))
    assert out_f32.shape == (batch, data_size)
    ref_f32 = reference_forward_folded(z, folded, matmul_dtype=jnp.float32)
    assert jnp.allclose(out_f32, ref_f32, atol=1e-4, rtol=1e-4), \
        "f32 kernel mismatch"

    # (c) bf16-matmul kernel (default fast path) vs. matching bf16 reference.
    out_bf16 = jax.block_until_ready(dense_decoder_forward(z, folded, tb=16))
    assert out_bf16.shape == (batch, data_size)
    ref_bf16 = reference_forward_folded(z, folded, matmul_dtype=jnp.bfloat16)
    assert jnp.allclose(out_bf16, ref_bf16, atol=1e-3, rtol=1e-3), \
        "bf16 kernel mismatch"

    print("KERNEL_OK")
</pallas_src>

<mosaic_0001>
module attributes {stable_mosaic.version = 11 : i64} {
  func.func @dense_decoder_kernel(%arg0: i32, %arg1: memref<16x16xf32, #tpu.memory_space<vmem>>, %arg2: memref<16x32xf32, #tpu.memory_space<vmem>>, %arg3: memref<1x32xf32, #tpu.memory_space<vmem>>, %arg4: memref<32x32xf32, #tpu.memory_space<vmem>>, %arg5: memref<1x32xf32, #tpu.memory_space<vmem>>, %arg6: memref<32x64xf32, #tpu.memory_space<vmem>>, %arg7: memref<1x64xf32, #tpu.memory_space<vmem>>, %arg8: memref<16x64xf32, #tpu.memory_space<vmem>>) attributes {dimension_semantics = [#tpu.dimension_semantics<parallel>], iteration_bounds = array<i64: 2>, scalar_prefetch = 0 : i64, scratch_operands = 0 : i64, tpu.core_type = #tpu.core_type<tc>, window_params = [{transform_indices = @transform_0, window_bounds = array<i64: 16, 16>}, {pipeline_mode = #tpu.pipeline_mode<synchronous>, transform_indices = @transform_1, window_bounds = array<i64: 16, 32>}, {pipeline_mode = #tpu.pipeline_mode<synchronous>, transform_indices = @transform_2, window_bounds = array<i64: 1, 32>}, {pipeline_mode = #tpu.pipeline_mode<synchronous>, transform_indices = @transform_3, window_bounds = array<i64: 32, 32>}, {pipeline_mode = #tpu.pipeline_mode<synchronous>, transform_indices = @transform_4, window_bounds = array<i64: 1, 32>}, {pipeline_mode = #tpu.pipeline_mode<synchronous>, transform_indices = @transform_5, window_bounds = array<i64: 32, 64>}, {pipeline_mode = #tpu.pipeline_mode<synchronous>, transform_indices = @transform_6, window_bounds = array<i64: 1, 64>}, {transform_indices = @transform_7, window_bounds = array<i64: 16, 64>}]} {
    %c0 = arith.constant 0 : index
    %c0_0 = arith.constant 0 : index
    %0 = vector.load %arg1[%c0, %c0_0] : memref<16x16xf32, #tpu.memory_space<vmem>>, vector<16x16xf32>
    %c0_1 = arith.constant 0 : index
    %c0_2 = arith.constant 0 : index
    %1 = vector.load %arg2[%c0_1, %c0_2] : memref<16x32xf32, #tpu.memory_space<vmem>>, vector<16x32xf32>
    %cst = arith.constant dense<0.000000e+00> : vector<16x32xf32>
    %2 = tpu.matmul %0, %1, %cst {dimension_numbers = #tpu.dot_dimension_numbers<[1], [0], [0], [1], [0, 0, 1, 1], [], []>} : vector<16x16xf32>, vector<16x32xf32>, vector<16x32xf32> -> vector<16x32xf32>
    %c0_3 = arith.constant 0 : index
    %c0_4 = arith.constant 0 : index
    %3 = vector.load %arg3[%c0_3, %c0_4] : memref<1x32xf32, #tpu.memory_space<vmem>>, vector<1x32xf32>
    %4 = vector.broadcast %3 : vector<1x32xf32> to vector<16x32xf32>
    %5 = arith.addf %2, %4 : vector<16x32xf32>
    %cst_5 = arith.constant 0.000000e+00 : f32
    %6 = vector.broadcast %cst_5 : f32 to vector<16x32xf32>
    %7 = arith.cmpf ogt, %5, %6 : vector<16x32xf32>
    %cst_6 = arith.constant 2.000000e-01 : f32
    %8 = vector.broadcast %cst_6 : f32 to vector<16x32xf32>
    %9 = arith.mulf %8, %5 : vector<16x32xf32>
    %10 = arith.select %7, %5, %9 : vector<16x32xi1>, vector<16x32xf32>
    %c0_7 = arith.constant 0 : index
    %c0_8 = arith.constant 0 : index
    %11 = vector.load %arg4[%c0_7, %c0_8] : memref<32x32xf32, #tpu.memory_space<vmem>>, vector<32x32xf32>
    %cst_9 = arith.constant dense<0.000000e+00> : vector<16x32xf32>
    %12 = tpu.matmul %10, %11, %cst_9 {dimension_numbers = #tpu.dot_dimension_numbers<[1], [0], [0], [1], [0, 0, 1, 1], [], []>} : vector<16x32xf32>, vector<32x32xf32>, vector<16x32xf32> -> vector<16x32xf32>
    %c0_10 = arith.constant 0 : index
    %c0_11 = arith.constant 0 : index
    %13 = vector.load %arg5[%c0_10, %c0_11] : memref<1x32xf32, #tpu.memory_space<vmem>>, vector<1x32xf32>
    %14 = vector.broadcast %13 : vector<1x32xf32> to vector<16x32xf32>
    %15 = arith.addf %12, %14 : vector<16x32xf32>
    %cst_12 = arith.constant 0.000000e+00 : f32
    %16 = vector.broadcast %cst_12 : f32 to vector<16x32xf32>
    %17 = arith.cmpf ogt, %15, %16 : vector<16x32xf32>
    %cst_13 = arith.constant 2.000000e-01 : f32
    %18 = vector.broadcast %cst_13 : f32 to vector<16x32xf32>
    %19 = arith.mulf %18, %15 : vector<16x32xf32>
    %20 = arith.select %17, %15, %19 : vector<16x32xi1>, vector<16x32xf32>
    %c0_14 = arith.constant 0 : index
    %c0_15 = arith.constant 0 : index
    %21 = vector.load %arg6[%c0_14, %c0_15] : memref<32x64xf32, #tpu.memory_space<vmem>>, vector<32x64xf32>
    %cst_16 = arith.constant dense<0.000000e+00> : vector<16x64xf32>
    %22 = tpu.matmul %20, %21, %cst_16 {dimension_numbers = #tpu.dot_dimension_numbers<[1], [0], [0], [1], [0, 0, 1, 1], [], []>} : vector<16x32xf32>, vector<32x64xf32>, vector<16x64xf32> -> vector<16x64xf32>
    %c0_17 = arith.constant 0 : index
    %c0_18 = arith.constant 0 : index
    %23 = vector.load %arg7[%c0_17, %c0_18] : memref<1x64xf32, #tpu.memory_space<vmem>>, vector<1x64xf32>
    %24 = vector.broadcast %23 : vector<1x64xf32> to vector<16x64xf32>
    %25 = arith.addf %22, %24 : vector<16x64xf32>
    %c0_19 = arith.constant 0 : index
    %c0_20 = arith.constant 0 : index
    %26 = vector.load %arg8[%c0_19, %c0_20] : memref<16x64xf32, #tpu.memory_space<vmem>>, vector<16x64xf32>
    tpu.vector_store %arg8[%c0_19, %c0_20], %25 {strides = array<i32>} : memref<16x64xf32, #tpu.memory_space<vmem>>, vector<16x64xf32>,
    return
  }
  func.func @transform_0(%arg0: i32) -> (i32, i32) {
    %c0_i32 = arith.constant 0 : i32
    %c0_i32_0 = arith.constant 0 : i32
    return %arg0, %c0_i32 : i32, i32
  }
  func.func @transform_1(%arg0: i32) -> (i32, i32) {
    %c0_i32 = arith.constant 0 : i32
    %c0_i32_0 = arith.constant 0 : i32
    %c0_i32_1 = arith.constant 0 : i32
    return %c0_i32, %c0_i32_0 : i32, i32
  }
  func.func @transform_2(%arg0: i32) -> (i32, i32) {
    %c0_i32 = arith.constant 0 : i32
    %c0_i32_0 = arith.constant 0 : i32
    %c0_i32_1 = arith.constant 0 : i32
    return %c0_i32, %c0_i32_0 : i32, i32
  }
  func.func @transform_3(%arg0: i32) -> (i32, i32) {
    %c0_i32 = arith.constant 0 : i32
    %c0_i32_0 = arith.constant 0 : i32
    %c0_i32_1 = arith.constant 0 : i32
    return %c0_i32, %c0_i32_0 : i32, i32
  }
  func.func @transform_4(%arg0: i32) -> (i32, i32) {
    %c0_i32 = arith.constant 0 : i32
    %c0_i32_0 = arith.constant 0 : i32
    %c0_i32_1 = arith.constant 0 : i32
    return %c0_i32, %c0_i32_0 : i32, i32
  }
  func.func @transform_5(%arg0: i32) -> (i32, i32) {
    %c0_i32 = arith.constant 0 : i32
    %c0_i32_0 = arith.constant 0 : i32
    %c0_i32_1 = arith.constant 0 : i32
    return %c0_i32, %c0_i32_0 : i32, i32
  }
  func.func @transform_6(%arg0: i32) -> (i32, i32) {
    %c0_i32 = arith.constant 0 : i32
    %c0_i32_0 = arith.constant 0 : i32
    %c0_i32_1 = arith.constant 0 : i32
    return %c0_i32, %c0_i32_0 : i32, i32
  }
  func.func @transform_7(%arg0: i32) -> (i32, i32) {
    %c0_i32 = arith.constant 0 : i32
    %c0_i32_0 = arith.constant 0 : i32
    return %arg0, %c0_i32 : i32, i32
  }
}

</mosaic_0001>

<bundles_post_ra>
// kernel: tpu_custom_call.1
= control target key start
LH: loop header
LB: loop body
LE: loop exit
PB: predicated region body
PF: predicated region fallthrough
CT: control target
= control target key end

     0   :  { %12 = vsyncpa [#allocation3], 0  ;;  %s1135_s0 = inlined_call_operand.vmem [shape: f32[32,16], index: 0, kind: input, shape index: {}]   ;;  %s1136_s1 = inlined_call_operand.hbm [shape: f32[16,32], index: 1, kind: input, shape index: {}]   ;;  %s1137_s2 = inlined_call_operand.vmem [shape: f32[1,32], index: 2, kind: input, shape index: {}]   ;;  %s1138_s3 = inlined_call_operand.vmem [shape: f32[32,32], index: 3, kind: input, shape index: {}]   ;;  %s1139_s4 = inlined_call_operand.vmem [shape: f32[1,32], index: 4, kind: input, shape index: {}]   ;;  %s1140_s5 = inlined_call_operand.vmem [shape: f32[32,64], index: 5, kind: input, shape index: {}]   ;;  %s1141_s6 = inlined_call_operand.vmem [shape: f32[1,64], index: 6, kind: input, shape index: {}]   ;;  %s1142_s7 = inlined_call_operand.hbm [shape: f32[32,64], index: 7, kind: output, shape index: {}]  }
   0x1   :  { %13 = vsyncpa [#allocation4], 0 }
   0x2   :  { %15 = vsyncpa [#allocation4 + $0x1], 0  ;;  %s961_s24 = smov 0   ;;  %s963_s25 = smov 0  }
   0x3   :  { %s965_s26 = smov 0   ;;  %s967_s27 = smov 0  }
   0x4 LB: > { %s982_s28 = sadd.s32 4294967295, %s913_s27   ;;  %s676_s29 = sadd.s32 4294967294, %s913_s27   ;;  %s913_s27 = sphi %s967_s27, %s1158_s27   ;;  %s909_s26 = sphi %s965_s26, %s1157_s26   ;;  %s905_s25 = sphi %s963_s25, %s1156_s25   ;;  %s901_s24 = sphi %s961_s24, %s1155_s24  }
   0x5   : > { %s986_s30 = sadd.s32 1, %s913_s27   ;;  %s180_s8 = sadd.s32 1, %s909_s26 }
   0x6   : > { %s177_s9 = ssub.s32 %s913_s27, %s986_s30  ;;  %p190_p0 = scmp.ne.s32.totalorder %s909_s26, %s905_s25 }
   0x7   : > { %p178_p1 = scmp.eq.s32.totalorder %s177_s9, 0  ;;  %p191_p2 = scmp.eq.s32.totalorder %s982_s28, 1 }
   0x8   : > { %p196_p3 = scmp.ne.s32.totalorder %s905_s25, %s901_s24  ;;  %p197_p4 = scmp.eq.s32.totalorder %s676_s29, 1 }
   0x9   : > { %s997_s10 = scalar_select %p178_p1, %s909_s26, %s180_s8  }
   0xa   : > { %p999_p5 = por %p191_p2, %p190_p0  ;;  %p1003_p6 = por %p197_p4, %p196_p3 }
   0xb   : > { %p677_p7 = scmp.ge.s32.totalorder %s913_s27, 1  ;;  %p204_p8 = scmp.lt.s32.totalorder %s913_s27, 3 }
   0xc   : > { %s1146_s11 = scalar_select %p999_p5, 1, 0 }
   0xd   : > { %s1147_s12 = scalar_select %p1003_p6, 1, 0 }
   0xe   : > { %p1143_p9 = scmp.eq.s32.totalorder %s982_s28, 0  ;;  %p1010_p10 = pnand %p677_p7, %p204_p8 }
   0xf   : > { %s915_s14 = smov [#allocation2]   ;;  %s819_s19 = scalar_lea.hbm %s1136_s1, 256 }
  0x10   : > { %s1148_s13 = scalar_select %p1010_p10, 1, 0 }
  0x11   : > { %s216_s15 = sshll.u32 %s915_s14, 4  ;;  %p771_p11 = pneg %p1010_p10  ;;  %s217_s15 = int_to_ptr.vmem [resolvable:$true] %s216_s15 }
  0x12   : > { %p820_p13 = scmp.ne.s32.totalorder %s1136_s1, %s819_s19  ;;  %p826_p3 = scmp.lt.u32.totalorder %s819_s19, %s1136_s1 }
  0x13   : > { %p1018_p12 = pnand %p1143_p9, %p771_p11 }
  0x15   : > { %p821_p0 = pneg %p1018_p12 }
  0x17   : > { %p822_p1 = pnand %p821_p0, %p820_p13 }
  0x19   : > { %p823_p2 = pneg %p822_p1 }
  0x1b   : > { %p828_p4 = pnand %p826_p3, %p823_p2 }
  0x1d   : > { %831 = shalt.err (!%p828_p4)
}
  0x1e   : > { %s832_s29 = scalar_lea.vmem %s217_s15, 256  ;;  %p840_p9 = scmp.lt.s32.totalorder %s217_s15, %s217_s15 }
  0x1f   : > { %p833_p7 = scmp.ne.s32.totalorder %s217_s15, %s832_s29  ;;  %p841_p6 = scmp.lt.s32.totalorder %s832_s29, %s832_s29 }
  0x21   : > { %p835_p8 = pnand %p833_p7, %p821_p0  ;;  %p842_p5 = por %p841_p6, %p840_p9 }
  0x23   : > { %p836_p11 = pneg %p835_p8 }
  0x25   : > { %p843_p10 = pnand %p842_p5, %p836_p11 }
  0x27   : > { %846 = shalt.err (!%p843_p10)
}
  0x28   : > { %s916_s8 = smov 128   ;;  %s917_s9 = smov 8  }
  0x29   : > { %774 = dma.hbm_to_vmem [thread:$0]  (!%p1018_p12), %s1136_s1, 256, %s217_s15, [#allocation3], %s916_s8, %s916_s8, %s917_s9  }
  0x2a   : > { %p1150_p13 = scmp.ne.s32.totalorder %s1148_s13, 0 }
  0x2b   : > { %p1151_p1 = scmp.eq.s32.totalorder (!%p1150_p13), %s982_s28, 0 }
  0x2c   : > { %256 = sbr.rel (%p1150_p13) target bundleno = 728 (0x2d8), region = 48 }
  0x33   : > { %892 = dma.done.wait (%p1151_p1), [#allocation3], 256   ;;  %p1152_p0 = pmov %p1151_p1 }
  0x34   : > { %s683_s18 = sshll.u32 %s982_s28, 1  ;;  %vm306_vm0 = vcmask 130048   ;;  %v297_v0 = vld [vmem:[#allocation2] sm:$0xff]  ;;  %v298_v1 = vld [vmem:[#allocation2 + $0x8] sm:$0xff]  ;;  %v396_v8 = vld [vmem:[%s1138_s3 + $0x10] sm:$0xff]  ;;  %vm405_vm3 = vcmask 261120  }
  0x35   : > { %894 = vsyncadd (%p1152_p0), [#allocation3], 4294967040  ;;  %p289_p5 = scmp.lt.s32.totalorder %s683_s18, 3  ;;  %v745_v3 = vpack.c.bf16 %v298_v1, %v297_v0  ;;  %v394_v5 = vld [vmem:[%s1138_s3] sm:$0xff]  ;;  %v395_v6 = vld [vmem:[%s1138_s3 + $0x8] sm:$0xff]  ;;  %s285_s9 = sand.u32 1, %s905_s25  }
  0x36   : > { %v749_v7 = vpack.c.bf16 %v395_v6, %v394_v5  ;;  %v397_v9 = vld [vmem:[%s1138_s3 + $0x18] sm:$0xff]  ;;  %v685_v11 = vld [vmem:[%s1137_s2] ss:$0 sm:$0xff]  ;;  %v494_v21 = vld [vmem:[%s1140_s5 + $0x8] sm:$0xff]  ;;  %s682_s14 = sshll.u32 %s285_s9, 4  ;;  %s699_s20 = sshll.u32 %s982_s28, 8 }
  0x37   : > { %s1160_s18 = smov (!%p289_p5, %s683_s18), 3  ;;  %746 = vmatprep.subr.bf16.mxu0 %v745_v3  ;;  %v753_v10 = vpack.c.bf16 %v397_v9, %v396_v8  ;;  %v493_v20 = vld [vmem:[%s1140_s5] sm:$0xff]  ;;  %v495_v23 = vld [vmem:[%s1140_s5 + $0x10] sm:$0xff]  ;;  %v496_v24 = vld [vmem:[%s1140_s5 + $0x18] sm:$0xff]  ;;  %vm585_vm6 = vcmask 523264   ;;  %s1092_s15 = scalar_lea.hbm %s1142_s7, %s699_s20 }
  0x38   : > { %s684_s19 = sshll.u32 %s1160_s18, 3  ;;  %748 = vmatpush3.bf16.msra.mxu0 %v745_v3  ;;  %750 = vmatprep.subr.bf16.mxu1 %v749_v7  ;;  %v757_v22 = vpack.c.bf16 %v494_v21, %v493_v20  ;;  %v761_v25 = vpack.c.bf16 %v496_v24, %v495_v23  ;;  %v688_v26 = vld [vmem:[%s1139_s4] ss:$0 sm:$0xff]  ;;  %s1094_s22 = scalar_lea.sflag [#allocation4], %s285_s9 }
  0x39   : > { %s292_s21 = scalar_lea.vmem %s1135_s0, %s684_s19  ;;  %752 = vmatpush3.bf16.msra.mxu1 %v749_v7  ;;  %v691_v35 = vld [vmem:[%s1141_s6] ss:$0 sm:$0xff]  ;;  %s287_s19 = scalar_lea.vmem [#allocation5], %s682_s14 }
  0x3a   : > { %v295_v2 = vld [vmem:[%s292_s21] sm:$0xff]  ;;  %v296_v4 = vld [vmem:[%s292_s21 + $0x8] sm:$0xff]  ;;  %754 = vmatprep.subr.bf16.mxu1 %v753_v10  ;;  %758 = vmatprep.subr.bf16.mxu0 %v757_v22  ;;  %s602_s16 = sshll.u32 %s287_s19, 4  ;;  %p1153_p9 = scmp.ne.s32.totalorder %s1146_s11, 0  ;;  %s1087_s16 = int_to_ptr.vmem [resolvable:$true] %s602_s16 }
  0x3b   : > { %720 = vmatprep.mubr.msk.f32.mxu0 %vm306_vm0, %v295_v2  ;;  %s847_s28 = scalar_lea.vmem %s1087_s16, 256  ;;  %s918_s23 = smov [#allocation5]  }
  0x3c   : > { %721 = vmatmul.mubr.msk.f32.vlgmr.msra.gmra.mrb[0].mxu0 %vm306_vm0, %v296_v4  ;;  %p848_p6 = scmp.ne.s32.totalorder %s1087_s16, %s847_s28  ;;  %s851_s29 = sshll.u32 %s918_s23, 4  ;;  %s852_s29 = int_to_ptr.vmem [resolvable:$false] %s851_s29 }
  0x3d   : > { %756 = vmatpush3.bf16.msra.mxu1 %v753_v10  ;;  %760 = vmatpush3.bf16.msra.mxu0 %v757_v22  ;;  %s853_s8 = scalar_lea.vmem %s852_s29, 512  ;;  %p854_p2 = scmp.lt.s32.totalorder %s1087_s16, %s852_s29 }
  0x3e   : > { %762 = vmatprep.subr.bf16.mxu0 %v761_v25  ;;  %p849_p10 = pnand %p848_p6, %p1153_p9  ;;  %p855_p3 = scmp.lt.s32.totalorder %s853_s8, %s847_s28 }
  0x40   : > { %p850_p12 = pneg %p849_p10  ;;  %p856_p4 = por %p855_p3, %p854_p2 }
  0x41   : > { %764 = vmatpush3.bf16.msra.mxu0 %v761_v25 }
  0x42   : > { %p857_p7 = pnand %p856_p4, %p850_p12 }
 0x10f   : > { %v722_v12 = vpop.f32.mrb[0].mxu0 }
 0x110   : > { %v385_v13 = vadd.f32 %v722_v12, %v685_v11  ;;  %v379_v14 = vpop.f32.mrb[1].mxu0 }
 0x111   : > { %v380_v15 = vadd.f32 %v685_v11, %v379_v14 }
 0x112   : > { %v391_v16 = vmul.f32 0.2, %v385_v13  ;;  %vm389_vm1 = vcmp.gt.f32.partialorder %v385_v13, 0.0 }
 0x113   : > { %vm388_vm2 = vcmp.gt.f32.partialorder %v380_v15, 0.0  ;;  %v390_v17 = vmul.f32 0.2, %v380_v15 }
 0x114   : > { %v393_v19 = vsel %vm389_vm1, %v385_v13, %v391_v16 }
 0x115   : > { %v392_v18 = vsel %vm388_vm2, %v380_v15, %v390_v17 }
 0x116   : > { %731 = vmatprep.mubr.msk.f32.mxu1 %vm405_vm3, %v392_v18 }
 0x117   : > { %732 = vmatmul.mubr.msk.f32.vlgmr.msra.gmra.mrb[0].mxu1 %vm405_vm3, %v393_v19 }
 0x1ea   : > { %v733_v27 = vpop.f32.mrb[0].mxu1 }
 0x1eb   : > { %v484_v28 = vadd.f32 %v733_v27, %v688_v26  ;;  %v478_v29 = vpop.f32.mrb[1].mxu1 }
 0x1ec   : > { %v479_v30 = vadd.f32 %v688_v26, %v478_v29 }
 0x1ed   : > { %v490_v31 = vmul.f32 0.2, %v484_v28  ;;  %vm488_vm4 = vcmp.gt.f32.partialorder %v484_v28, 0.0 }
 0x1ee   : > { %vm487_vm5 = vcmp.gt.f32.partialorder %v479_v30, 0.0  ;;  %v489_v32 = vmul.f32 0.2, %v479_v30 }
 0x1ef   : > { %v492_v34 = vsel %vm488_vm4, %v484_v28, %v490_v31 }
 0x1f0   : > { %v491_v33 = vsel %vm487_vm5, %v479_v30, %v489_v32 }
 0x1f1   : > { %742 = vmatprep.mubr.msk.f32.mxu0 %vm405_vm3, %v491_v33 }
 0x1f2   : > { %743 = vmatmul.mubr.msk.f32.vlgmr.msra.gmra.mrb[2].mxu0 %vm405_vm3, %v492_v34 }
 0x2c5   : > { %v744_v36 = vpop.f32.mrb[2].mxu0 }
 0x2c6   : > { %v582_v37 = vadd.f32 %v744_v36, %v691_v35  ;;  %v576_v38 = vpop.f32.mrb[3].mxu0 }
 0x2c7   : > { %v577_v39 = vadd.f32 %v691_v35, %v576_v38 }
 0x2c8   : > { %587 = vst.msk [vmem:[%s287_s19 + $0x8] sm:$0xff] %vm585_vm6, %v582_v37 }
 0x2c9   : > { %586 = vst.msk [vmem:[%s287_s19] sm:$0xff] %vm585_vm6, %v577_v39 }
 0x2ca   : > { %860 = shalt.err (!%p857_p7)
}
 0x2cb   : > { %s861_s9 = scalar_lea.hbm %s1092_s15, 256  ;;  %s865_s18 = scalar_lea.hbm %s1142_s7, 512 }
 0x2cc   : > { %p862_p8 = scmp.ne.s32.totalorder %s1092_s15, %s861_s9  ;;  %p866_p1 = scmp.lt.u32.totalorder %s1092_s15, %s1142_s7 }
 0x2cd   : > { %p867_p0 = scmp.lt.u32.totalorder %s865_s18, %s861_s9  ;;  %p869_p6 = scmp.lt.u32.totalorder %s861_s9, %s1092_s15 }
 0x2ce   : > { %p863_p11 = pnand %p862_p8, %p1153_p9 }
 0x2cf   : > { %p868_p5 = por %p867_p0, %p866_p1 }
 0x2d0   : > { %p864_p13 = pneg %p863_p11 }
 0x2d1   : > { %p870_p10 = por %p869_p6, %p868_p5 }
 0x2d3   : > { %p871_p12 = pnand %p870_p10, %p864_p13 }
 0x2d5   : > { %874 = shalt.err (!%p871_p12)
}
 0x2d6   : > { %s919_s21 = smov 128   ;;  %s920_s13 = smov 8  }
 0x2d7   : > { %769 = dma.vmem_to_hbm [thread:$0]  (%p1153_p9), %s1087_s16, 256, %s1092_s15, %s1094_s22, %s919_s21, %s919_s21, %s920_s13  }
 0x2d8 PF: > { %p781_p2 = scmp.ge.s32.totalorder %s913_s27, 2  ;;  %s617_s28 = sand.u32 1, %s901_s24  }
 0x2d9   : > { %p1154_p3 = scmp.ne.s32.totalorder %s1147_s12, 0  ;;  %s618_s23 = scalar_lea.sflag [#allocation4], %s617_s28 }
 0x2db   : > { %p776_p4 = pnand %p781_p2, %p1154_p3 }
 0x2dd   : > { %896 = dma.done.wait (!%p776_p4), %s618_s23, 256  }
 0x2de   : > { %898 = vsyncadd (!%p776_p4), %s618_s23, 4294967040  ;;  %p18_p7 = scmp.ge.s32.totalorder %s986_s30, 4   ;;  %s1155_s24 = smov %s905_s25 }
 0x2df   : > { %s1156_s25 = smov %s909_s26  ;;  %s1157_s26 = smov %s997_s10 }
 0x2e0   : > { %s1158_s27 = smov %s986_s30  ;;  %20 = sbr.rel (!%p18_p7) target bundleno = 4 (0x4), region = 88 }
 0x2e7   :  { %623 = vsyncpa [#allocation3], 1 }
 0x2e8   :  { %625 = vsyncpa [#allocation3 + $0x1], 1 }
 0x2e9   :  { %626 = vsyncpa [#allocation4], 1 }
 0x2ea   :  { %628 = vsyncpa [#allocation4 + $0x1], 1 }

</bundles_post_ra>
